<compile_context>
chip_gen: v5e
topology: v5e:2x2
jax: 0.10.0
libtpu: 0.0.40
codegen_flags: <defaults>
</compile_context>

<pallas_src>
import functools

import jax
import jax.numpy as jnp
import numpy as np
from jax import lax
from jax.experimental import pallas as pl
from jax.experimental.pallas import tpu as pltpu


def _round_up(x: int, m: int) -> int:
    return ((x + m - 1) // m) * m


def _make_partial_kernel(n, d, tk, kpc, mxu_dtype, needs_mask):
    """Accumulate raw s @ pp^T and raw per-row squared norms over the K stream."""

    def kernel(s_ref, p_ref, cross_ref, s_sq_ref, p_sq_ref):
        k = pl.program_id(1)  # K step within this core's slice

        @pl.when(k == 0)
        def _init():
            cross_ref[...] = jnp.zeros_like(cross_ref)
            s_sq_ref[...] = jnp.zeros_like(s_sq_ref)
            p_sq_ref[...] = jnp.zeros_like(p_sq_ref)

        def accumulate(s_t, p_t):
            # Raw per-row squared norms, f32 accumulation (VPU + XLU reduce).
            s_f = s_t.astype(jnp.float32)
            p_f = p_t.astype(jnp.float32)
            s_sq_ref[...] += jnp.sum(s_f * s_f, axis=1, keepdims=True)
            p_sq_ref[...] += jnp.sum(p_f * p_f, axis=1, keepdims=True)
            # Raw cross term on the MXU, f32 accumulation.
            cross_ref[...] += lax.dot_general(
                s_t.astype(mxu_dtype), p_t.astype(mxu_dtype),
                (((1,), (1,)), ((), ())),
                preferred_element_type=jnp.float32)

        s_t = s_ref[...]
        p_t = p_ref[...]

        if not needs_mask:
            accumulate(s_t, p_t)
        else:
            # Global K-block index of this step. The tail block (and any
            # clamped duplicate block when the K range doesn't split evenly
            # across cores) has lanes >= rem that must be zeroed: Pallas OOB
            # block lanes hold garbage, not zeros.
            kk = pl.program_id(0) * kpc + k
            rem = d - kk * tk  # number of valid lanes in this block (may be <= 0)

            @pl.when(rem >= tk)
            def _full():
                accumulate(s_t, p_t)

            @pl.when(rem < tk)
            def _tail():
                lane = lax.broadcasted_iota(jnp.int32, (n, tk), 1)
                valid = lane < rem
                accumulate(jnp.where(valid, s_t, 0), jnp.where(valid, p_t, 0))

    return kernel


@functools.partial(jax.jit, static_argnames=("delta", "tk"))
def triplet_loss(s, pp, pn, delta=0.3, tk=None):
    """Forward of TripletLoss -> (max_loss, mean_loss).

    `pn` (and the constructor's custom `dist` callable) are never used by the
    reference forward; `pn` is kept for API parity only.
    """
    del pn  # unused by the reference forward
    n = s.shape[0]
    # Keep the original dtype in HBM -- no wrapper-side widening/narrowing.
    s2 = s.reshape(n, -1)
    pp2 = pp.reshape(n, -1)
    d = s2.shape[1]
    itemsize = jnp.dtype(s2.dtype).itemsize

    # ---- generation-aware tile / VMEM budget -------------------------------
    try:
        kind = jax.devices()[0].device_kind.lower()
    except Exception:  # e.g. interpret mode on a non-TPU backend
        kind = ""
    is_v7 = "v7" in kind
    tile_budget = (16 << 20) if is_v7 else (32 << 20)  # double-buffered input tiles
    vmem_cap = (48 << 20) if is_v7 else (96 << 20)     # leave headroom vs physical VMEM

    # ---- lane-aligned K tile width -----------------------------------------
    if d <= 128:
        tk = d  # single block equal to the full feature dim (always legal)
    else:
        if tk is None:
            tk = tile_budget // (2 * 2 * max(n, 8) * itemsize)  # 2 inputs x 2 buffers
        tk = max(128, (int(tk) // 128) * 128)                   # lane aligned
        tk = min(tk, (d // 128) * 128)                          # block never wider than D

    num_k = (d + tk - 1) // tk           # K blocks covering D (last may be partial)
    num_cores = 2 if num_k >= 2 else 1   # split K across TCs; free on 1-TC chips
    kpc = (num_k + num_cores - 1) // num_cores
    needs_mask = (d % tk != 0) or (num_cores * kpc != num_k)

    last_blk = num_k - 1
    if num_cores * kpc == num_k:
        def in_map(c, k):
            return (0, c * kpc + k)
    else:
        def in_map(c, k):
            # Clamp so the DMA never walks past the last K block; the kernel
            # masks the duplicated read to zero.
            return (0, jnp.minimum(c * kpc + k, last_blk))

    # MXU operand dtype: keep the (exact) input dtype while HBM-bound (small n);
    # only drop f32 -> bf16 when n is large enough for matmul time to matter.
    if n > 64 and jnp.dtype(s2.dtype) == jnp.dtype(jnp.float32):
        mxu_dtype = jnp.bfloat16
    else:
        mxu_dtype = s2.dtype

    # VMEM request: 2 inputs x 2 pipeline buffers x (n, tk) tile + resident
    # per-core f32 partial outputs + headroom, clamped generation-aware.
    tile_bytes = 2 * 2 * max(n, 8) * tk * itemsize
    acc_bytes = 2 * 4 * (n * n + 2 * n)
    vmem_limit = int(min(max(tile_bytes + acc_bytes + (8 << 20), 32 << 20), vmem_cap))

    kernel = _make_partial_kernel(n, d, tk, kpc, mxu_dtype, needs_mask)
    cross_p, s_sq_p, p_sq_p = pl.pallas_call(
        kernel,
        out_shape=(
            jax.ShapeDtypeStruct((num_cores, n, n), jnp.float32),
            jax.ShapeDtypeStruct((num_cores, n, 1), jnp.float32),
            jax.ShapeDtypeStruct((num_cores, n, 1), jnp.float32),
        ),
        grid_spec=pltpu.PrefetchScalarGridSpec(
            num_scalar_prefetch=0,
            grid=(num_cores, kpc),
            in_specs=[
                pl.BlockSpec((n, tk), in_map),
                pl.BlockSpec((n, tk), in_map),
            ],
            out_specs=(
                pl.BlockSpec((None, n, n), lambda c, k: (c, 0, 0)),
                pl.BlockSpec((None, n, 1), lambda c, k: (c, 0, 0)),
                pl.BlockSpec((None, n, 1), lambda c, k: (c, 0, 0)),
            ),
        ),
        compiler_params=pltpu.CompilerParams(
            dimension_semantics=("parallel", "arbitrary"),
            vmem_limit_bytes=vmem_limit,
        ),
    )(s2, pp2)

    # ---- O(n^2) finalize (tiny, fused by XLA) ------------------------------
    cross = jnp.sum(cross_p, axis=0)   # raw s @ pp^T     (n, n)
    s_sq = jnp.sum(s_sq_p, axis=0)     # raw ||s_i||^2    (n, 1)
    p_sq = jnp.sum(p_sq_p, axis=0)     # raw ||pp_j||^2   (n, 1)

    eps = 1e-12                                        # F.normalize default eps
    inv_s = lax.rsqrt(jnp.maximum(s_sq, eps * eps))    # 1 / max(||s_i||, eps)
    inv_p = lax.rsqrt(jnp.maximum(p_sq, eps * eps))
    c_n = cross * inv_s * inv_p.T                      # <s_i/.., pp_j/..>
    sn2 = s_sq * (inv_s * inv_s)                       # ||normalize(s_i)||^2 (=1 a.e.)
    pn2 = p_sq * (inv_p * inv_p)
    dists = sn2 + pn2.T - 2.0 * c_n                    # ||normalize(s_i)-normalize(pp_j)||^2

    # loss[i, j] = clamp(delta + dists[j, j] - dists[i, j], min=0)
    loss = jnp.maximum(delta + (jnp.diagonal(dists)[None, :] - dists), 0.0)

    # Off-diagonal selection == masked_select(...).view(n, n-1).
    # NOTE: n == 1 is degenerate (mean over n*(n-1)=0 entries), as in PyTorch.
    offd = ~jnp.eye(n, dtype=bool)
    max_loss = jnp.mean(jnp.max(jnp.where(offd, loss, -jnp.inf), axis=1))
    mean_loss = jnp.sum(jnp.where(offd, loss, 0.0)) / (n * (n - 1))
    return max_loss, mean_loss


def _triplet_loss_ref(s, pp, delta=0.3):
    """Pure-JAX f32 reference mirroring the PyTorch forward."""
    n = s.shape[0]
    s2 = s.reshape(n, -1).astype(jnp.float32)
    p2 = pp.reshape(n, -1).astype(jnp.float32)
    s_n = s2 / jnp.maximum(jnp.linalg.norm(s2, axis=1, keepdims=True), 1e-12)
    p_n = p2 / jnp.maximum(jnp.linalg.norm(p2, axis=1, keepdims=True), 1e-12)
    dists = jnp.sum((s_n[:, None, :] - p_n[None, :, :]) ** 2, axis=2)
    dists = -(dists - jnp.diag(dists)[None, :]) + delta
    dists = jnp.clip(dists, 0.0, None)
    eye = jnp.eye(n, dtype=bool)
    max_loss = jnp.mean(jnp.max(jnp.where(eye, -jnp.inf, dists), axis=1))
    mean_loss = jnp.sum(jnp.where(eye, 0.0, dists)) / (n * (n - 1))
    return max_loss, mean_loss


if __name__ == "__main__":
    key = jax.random.PRNGKey(0)
    k1, k2, k3 = jax.random.split(key, 3)
    # n=8 samples, features C*H*W = 6*8*8 = 384.
    n, c, h, w = 8, 6, 8, 8
    s = jax.random.normal(k1, (n, c, h, w), jnp.float32)
    pp = jax.random.normal(k2, (n, c, h, w), jnp.float32)
    pn = jax.random.normal(k3, (n, c, h, w), jnp.float32)

    ref_max, ref_mean = _triplet_loss_ref(s, pp, delta=0.3)

    # Default (auto) tile width: a single 384-wide K block.
    max_loss, mean_loss = triplet_loss(s, pp, pn, delta=0.3)
    jax.block_until_ready((max_loss, mean_loss))
    np.testing.assert_allclose(np.asarray(max_loss), np.asarray(ref_max), rtol=1e-2, atol=1e-2)
    np.testing.assert_allclose(np.asarray(mean_loss), np.asarray(ref_mean), rtol=1e-2, atol=1e-2)

    # Forced tk=128: 3 K blocks split across the 2-way parallel axis
    # (exercises the pipeline + the clamped/fully-masked overflow block).
    max2, mean2 = triplet_loss(s, pp, pn, delta=0.3, tk=128)
    jax.block_until_ready((max2, mean2))
    np.testing.assert_allclose(np.asarray(max2), np.asarray(ref_max), rtol=1e-2, atol=1e-2)
    np.testing.assert_allclose(np.asarray(mean2), np.asarray(ref_mean), rtol=1e-2, atol=1e-2)

    # Forced tk=256: last K block is a partial boundary block
    # (exercises the in-kernel tail-lane masking that replaced the jnp.pad).
    max3, mean3 = triplet_loss(s, pp, pn, delta=0.3, tk=256)
    jax.block_until_ready((max3, mean3))
    np.testing.assert_allclose(np.asarray(max3), np.asarray(ref_max), rtol=1e-2, atol=1e-2)
    np.testing.assert_allclose(np.asarray(mean3), np.asarray(ref_mean), rtol=1e-2, atol=1e-2)

    print("KERNEL_OK")
</pallas_src>

<mosaic_0001>
module attributes {stable_mosaic.version = 11 : i64} {
  func.func @kernel(%arg0: i32, %arg1: i32, %arg2: memref<8x384xf32, #tpu.memory_space<vmem>>, %arg3: memref<8x384xf32, #tpu.memory_space<vmem>>, %arg4: memref<1x8x8xf32, #tpu.memory_space<vmem>>, %arg5: memref<1x8x1xf32, #tpu.memory_space<vmem>>, %arg6: memref<1x8x1xf32, #tpu.memory_space<vmem>>) attributes {dimension_semantics = [#tpu.dimension_semantics<parallel>, #tpu.dimension_semantics<arbitrary>], iteration_bounds = array<i64: 1, 1>, scalar_prefetch = 0 : i64, scratch_operands = 0 : i64, tpu.core_type = #tpu.core_type<tc>, window_params = [{transform_indices = @transform_0, window_bounds = array<i64: 8, 384>}, {transform_indices = @transform_1, window_bounds = array<i64: 8, 384>}, {transform_indices = @transform_2, window_bounds = array<i64: 1, 8, 8>}, {transform_indices = @transform_3, window_bounds = array<i64: 1, 8, 1>}, {transform_indices = @transform_4, window_bounds = array<i64: 1, 8, 1>}]} {
    %c0_i32 = arith.constant 0 : i32
    %0 = arith.cmpi eq, %arg1, %c0_i32 : i32
    %1 = arith.extui %0 : i1 to i32
    %c0_i32_0 = arith.constant 0 : i32
    %2 = arith.cmpi ne, %1, %c0_i32_0 : i32
    scf.if %2 {
      %cst_24 = arith.constant 0.000000e+00 : f32
      %30 = vector.broadcast %cst_24 : f32 to vector<8x8xf32>
      %c0_25 = arith.constant 0 : index
      %c0_26 = arith.constant 0 : index
      %c0_27 = arith.constant 0 : index
      %31 = vector.load %arg4[%c0_25, %c0_26, %c0_27] : memref<1x8x8xf32, #tpu.memory_space<vmem>>, vector<1x8x8xf32>
      %32 = vector.shape_cast %31 : vector<1x8x8xf32> to vector<8x8xf32>
      %33 = vector.shape_cast %30 : vector<8x8xf32> to vector<1x8x8xf32>
      tpu.vector_store %arg4[%c0_25, %c0_26, %c0_27], %33 {strides = array<i32>} : memref<1x8x8xf32, #tpu.memory_space<vmem>>, vector<1x8x8xf32>,
      %cst_28 = arith.constant 0.000000e+00 : f32
      %34 = vector.broadcast %cst_28 : f32 to vector<8x1xf32>
      %c0_29 = arith.constant 0 : index
      %c0_30 = arith.constant 0 : index
      %c0_31 = arith.constant 0 : index
      %35 = vector.load %arg5[%c0_29, %c0_30, %c0_31] : memref<1x8x1xf32, #tpu.memory_space<vmem>>, vector<1x8x1xf32>
      %36 = vector.shape_cast %35 : vector<1x8x1xf32> to vector<8x1xf32>
      %37 = vector.shape_cast %34 : vector<8x1xf32> to vector<1x8x1xf32>
      tpu.vector_store %arg5[%c0_29, %c0_30, %c0_31], %37 {strides = array<i32>} : memref<1x8x1xf32, #tpu.memory_space<vmem>>, vector<1x8x1xf32>,
      %cst_32 = arith.constant 0.000000e+00 : f32
      %38 = vector.broadcast %cst_32 : f32 to vector<8x1xf32>
      %c0_33 = arith.constant 0 : index
      %c0_34 = arith.constant 0 : index
      %c0_35 = arith.constant 0 : index
      %39 = vector.load %arg6[%c0_33, %c0_34, %c0_35] : memref<1x8x1xf32, #tpu.memory_space<vmem>>, vector<1x8x1xf32>
      %40 = vector.shape_cast %39 : vector<1x8x1xf32> to vector<8x1xf32>
      %41 = vector.shape_cast %38 : vector<8x1xf32> to vector<1x8x1xf32>
      tpu.vector_store %arg6[%c0_33, %c0_34, %c0_35], %41 {strides = array<i32>} : memref<1x8x1xf32, #tpu.memory_space<vmem>>, vector<1x8x1xf32>,
    } else {
    }
    %c0 = arith.constant 0 : index
    %c0_1 = arith.constant 0 : index
    %3 = vector.load %arg2[%c0, %c0_1] : memref<8x384xf32, #tpu.memory_space<vmem>>, vector<8x384xf32>
    %c0_2 = arith.constant 0 : index
    %c0_3 = arith.constant 0 : index
    %4 = vector.load %arg3[%c0_2, %c0_3] : memref<8x384xf32, #tpu.memory_space<vmem>>, vector<8x384xf32>
    %c0_4 = arith.constant 0 : index
    %c0_5 = arith.constant 0 : index
    %c0_6 = arith.constant 0 : index
    %5 = vector.load %arg5[%c0_4, %c0_5, %c0_6] : memref<1x8x1xf32, #tpu.memory_space<vmem>>, vector<1x8x1xf32>
    %6 = vector.shape_cast %5 : vector<1x8x1xf32> to vector<8x1xf32>
    %7 = arith.mulf %3, %3 : vector<8x384xf32>
    %cst = arith.constant dense<0.000000e+00> : vector<8xf32>
    %8 = vector.multi_reduction <add>, %7, %cst [1] : vector<8x384xf32> to vector<8xf32>
    %9 = vector.shape_cast %8 : vector<8xf32> to vector<8x1xf32>
    %10 = arith.addf %6, %9 : vector<8x1xf32>
    %c0_7 = arith.constant 0 : index
    %c0_8 = arith.constant 0 : index
    %c0_9 = arith.constant 0 : index
    %11 = vector.load %arg5[%c0_7, %c0_8, %c0_9] : memref<1x8x1xf32, #tpu.memory_space<vmem>>, vector<1x8x1xf32>
    %12 = vector.shape_cast %11 : vector<1x8x1xf32> to vector<8x1xf32>
    %13 = vector.shape_cast %10 : vector<8x1xf32> to vector<1x8x1xf32>
    tpu.vector_store %arg5[%c0_7, %c0_8, %c0_9], %13 {strides = array<i32>} : memref<1x8x1xf32, #tpu.memory_space<vmem>>, vector<1x8x1xf32>,
    %c0_10 = arith.constant 0 : index
    %c0_11 = arith.constant 0 : index
    %c0_12 = arith.constant 0 : index
    %14 = vector.load %arg6[%c0_10, %c0_11, %c0_12] : memref<1x8x1xf32, #tpu.memory_space<vmem>>, vector<1x8x1xf32>
    %15 = vector.shape_cast %14 : vector<1x8x1xf32> to vector<8x1xf32>
    %16 = arith.mulf %4, %4 : vector<8x384xf32>
    %cst_13 = arith.constant dense<0.000000e+00> : vector<8xf32>
    %17 = vector.multi_reduction <add>, %16, %cst_13 [1] : vector<8x384xf32> to vector<8xf32>
    %18 = vector.shape_cast %17 : vector<8xf32> to vector<8x1xf32>
    %19 = arith.addf %15, %18 : vector<8x1xf32>
    %c0_14 = arith.constant 0 : index
    %c0_15 = arith.constant 0 : index
    %c0_16 = arith.constant 0 : index
    %20 = vector.load %arg6[%c0_14, %c0_15, %c0_16] : memref<1x8x1xf32, #tpu.memory_space<vmem>>, vector<1x8x1xf32>
    %21 = vector.shape_cast %20 : vector<1x8x1xf32> to vector<8x1xf32>
    %22 = vector.shape_cast %19 : vector<8x1xf32> to vector<1x8x1xf32>
    tpu.vector_store %arg6[%c0_14, %c0_15, %c0_16], %22 {strides = array<i32>} : memref<1x8x1xf32, #tpu.memory_space<vmem>>, vector<1x8x1xf32>,
    %c0_17 = arith.constant 0 : index
    %c0_18 = arith.constant 0 : index
    %c0_19 = arith.constant 0 : index
    %23 = vector.load %arg4[%c0_17, %c0_18, %c0_19] : memref<1x8x8xf32, #tpu.memory_space<vmem>>, vector<1x8x8xf32>
    %24 = vector.shape_cast %23 : vector<1x8x8xf32> to vector<8x8xf32>
    %cst_20 = arith.constant dense<0.000000e+00> : vector<8x8xf32>
    %25 = tpu.matmul %3, %4, %cst_20 {dimension_numbers = #tpu.dot_dimension_numbers<[1], [1], [0], [0], [0, 0, 1, 0], [], []>} : vector<8x384xf32>, vector<8x384xf32>, vector<8x8xf32> -> vector<8x8xf32>
    %26 = arith.addf %24, %25 : vector<8x8xf32>
    %c0_21 = arith.constant 0 : index
    %c0_22 = arith.constant 0 : index
    %c0_23 = arith.constant 0 : index
    %27 = vector.load %arg4[%c0_21, %c0_22, %c0_23] : memref<1x8x8xf32, #tpu.memory_space<vmem>>, vector<1x8x8xf32>
    %28 = vector.shape_cast %27 : vector<1x8x8xf32> to vector<8x8xf32>
    %29 = vector.shape_cast %26 : vector<8x8xf32> to vector<1x8x8xf32>
    tpu.vector_store %arg4[%c0_21, %c0_22, %c0_23], %29 {strides = array<i32>} : memref<1x8x8xf32, #tpu.memory_space<vmem>>, vector<1x8x8xf32>,
    return
  }
  func.func @transform_0(%arg0: i32, %arg1: i32) -> (i32, i32) {
    %c1_i32 = arith.constant 1 : i32
    %0 = arith.muli %arg0, %c1_i32 : i32
    %1 = arith.addi %0, %arg1 : i32
    %c0_i32 = arith.constant 0 : i32
    %c0_i32_0 = arith.constant 0 : i32
    return %c0_i32, %1 : i32, i32
  }
  func.func @transform_1(%arg0: i32, %arg1: i32) -> (i32, i32) {
    %c1_i32 = arith.constant 1 : i32
    %0 = arith.muli %arg0, %c1_i32 : i32
    %1 = arith.addi %0, %arg1 : i32
    %c0_i32 = arith.constant 0 : i32
    %c0_i32_0 = arith.constant 0 : i32
    return %c0_i32, %1 : i32, i32
  }
  func.func @transform_2(%arg0: i32, %arg1: i32) -> (i32, i32, i32) {
    %c0_i32 = arith.constant 0 : i32
    %c0_i32_0 = arith.constant 0 : i32
    %c0_i32_1 = arith.constant 0 : i32
    return %arg0, %c0_i32, %c0_i32_0 : i32, i32, i32
  }
  func.func @transform_3(%arg0: i32, %arg1: i32) -> (i32, i32, i32) {
    %c0_i32 = arith.constant 0 : i32
    %c0_i32_0 = arith.constant 0 : i32
    %c0_i32_1 = arith.constant 0 : i32
    return %arg0, %c0_i32, %c0_i32_0 : i32, i32, i32
  }
  func.func @transform_4(%arg0: i32, %arg1: i32) -> (i32, i32, i32) {
    %c0_i32 = arith.constant 0 : i32
    %c0_i32_0 = arith.constant 0 : i32
    %c0_i32_1 = arith.constant 0 : i32
    return %arg0, %c0_i32, %c0_i32_0 : i32, i32, i32
  }
}

</mosaic_0001>

<bundles_post_ra>
// kernel: triplet_loss.1
= control target key start
LH: loop header
LB: loop body
LE: loop exit
PB: predicated region body
PF: predicated region fallthrough
CT: control target
= control target key end

     0   :  { %vm64_vm0 = vcmask 7168   ;;  %v183_v3 = vmov 0.0   ;;  %vm62_vm1 = vcmask 64512   ;;  %s260_s1 = inlined_call_operand.vmem [shape: f32[8,384], index: 1, kind: input, shape index: {}]   ;;  %s261_s0 = inlined_call_operand.vmem [shape: f32[8,384], index: 0, kind: input, shape index: {}]   ;;  %s262_s3 = inlined_call_operand.vmem [shape: f32[1,8,1], index: 3, kind: output, shape index: {1}]   ;;  %s263_s4 = inlined_call_operand.vmem [shape: f32[1,8,1], index: 4, kind: output, shape index: {2}]   ;;  %s264_s2 = inlined_call_operand.vmem [shape: f32[1,8,8], index: 2, kind: output, shape index: {0}]  }
   0x1   :  { %v72_v0 = vld [vmem:[%s260_s1 + $0x10] sm:$0xff]  ;;  %v70_v2 = vld [vmem:[%s260_s1] sm:$0xff]  ;;  %65 = vst.msk [vmem:[%s262_s3] sm:$0xff] %vm64_vm0, %v183_v3  ;;  %v71_v4 = vld [vmem:[%s260_s1 + $0x8] sm:$0xff] }
   0x2   :  { %v69_v1 = vld [vmem:[%s261_s0 + $0x10] sm:$0xff]  ;;  %150 = vmatpush.xpose.msra.mxu2 %v72_v0  ;;  %110 = vmatpush.xpose.msra.mxu0 %v70_v2  ;;  %v67_v5 = vld [vmem:[%s261_s0] sm:$0xff]  ;;  %v68_v6 = vld [vmem:[%s261_s0 + $0x8] sm:$0xff]  ;;  %66 = vst.msk [vmem:[%s263_s4] sm:$0xff] %vm64_vm0, %v183_v3  ;;  %v85_v10 = vmul.f32 %v70_v2, %v70_v2  ;;  %v86_v11 = vmul.f32 %v71_v4, %v71_v4 }
   0x3   :  { %v76_v7 = vmul.f32 %v69_v1, %v69_v1  ;;  %130 = vmatpush.xpose.msra.mxu1 %v71_v4  ;;  %v74_v8 = vmul.f32 %v67_v5, %v67_v5  ;;  %v75_v9 = vmul.f32 %v68_v6, %v68_v6  ;;  %v87_v14 = vmul.f32 %v72_v0, %v72_v0 }
   0x4   :  { %v88_v15 = vadd.f32 %v86_v11, %v85_v10  ;;  %63 = vst.msk [vmem:[%s264_s2] sm:$0xff] %vm62_vm1, %v183_v3 }
   0x5   :  { %151 = vmatmul.f32.vlgmr.msra.gmra.mxu2 %v69_v1  ;;  %111 = vmatmul.f32.vlgmr.msra.gmra.mxu0 %v67_v5  ;;  %v77_v12 = vadd.f32 %v75_v9, %v74_v8 }
   0x6   :  { %131 = vmatmul.f32.vlgmr.msra.gmra.mxu1 %v68_v6  ;;  %v89_v16 = vadd.f32 %v88_v15, %v87_v14 }
   0x7   :  { %v78_v13 = vadd.f32 %v77_v12, %v76_v7 }
   0x8   :  { %v73_v17 = vld [vmem:[%s262_s3] sm:$0xff] }
   0x9   :  { %79 = vadd.xlane.f32.xlu0 %v78_v13  ;;  %v84_v21 = vld [vmem:[%s263_s4] sm:$0xff] }
   0xb   :  { %v94_v26 = vld [vmem:[%s264_s2] sm:$0xff] }
  0x11   :  { %90 = vadd.xlane.f32.xlu0 %v89_v16 }
  0x7c   :  { %v80_v18 = vpop.xlane.xlu0 %79 }
  0x7d   :  { %v81_v19 = vadd.f32 %v80_v18, %v73_v17 }
  0x7f   :  { %83 = vst.msk [vmem:[%s262_s3] sm:$0xff] %vm64_vm0, %v81_v19 }
  0x82   :  { %v112_v20 = vpop.f32.mrf.mxu0 }
  0x83   :  { %v132_v22 = vpop.f32.mrf.mxu1 }
  0x84   :  { %v91_v23 = vpop.xlane.xlu0 %90  ;;  %v133_v24 = vadd.f32 %v132_v22, %v112_v20 }
  0x85   :  { %v92_v25 = vadd.f32 %v91_v23, %v84_v21 }
  0x87   :  { %93 = vst.msk [vmem:[%s263_s4] sm:$0xff] %vm64_vm0, %v92_v25 }
  0x88   :  { %v152_v27 = vpop.f32.mrf.mxu2 }
  0x89   :  { %v153_v28 = vadd.f32 %v152_v27, %v133_v24 }
  0x8b   :  { %v155_v29 = vadd.f32 %v153_v28, %v94_v26 }
  0x8d   :  { %157 = vst.msk [vmem:[%s264_s2] sm:$0xff] %vm62_vm1, %v155_v29 }

</bundles_post_ra>
